<compile_context>
chip_gen: v6e
topology: v6e:2x2x1
jax: 0.10.0
libtpu: 0.0.40
codegen_flags: <defaults>
</compile_context>

<pallas_src>
import jax
import jax.numpy as jnp
from jax.experimental import pallas as pl
from jax.experimental.pallas import tpu as pltpu


def _policy_kernel(x_ref, w1_ref, b1_ref, w2_ref, b2_ref, w3_ref, b3_ref, o_ref):
    # Matmul inputs in bf16 (MXU), accumulation + elementwise in f32.
    x = x_ref[...].astype(jnp.bfloat16)

    # Layer 1: Linear(obs_dim -> h1) + ReLU
    h1 = jnp.dot(x, w1_ref[...], preferred_element_type=jnp.float32) + b1_ref[...]
    h1 = jnp.maximum(h1, 0.0)

    # Layer 2: Linear(h1 -> h2) + ReLU
    h2 = jnp.dot(h1.astype(jnp.bfloat16), w2_ref[...],
                 preferred_element_type=jnp.float32) + b2_ref[...]
    h2 = jnp.maximum(h2, 0.0)

    # Output layer: Linear(h2 -> act_dim) + Tanh
    out = jnp.dot(h2.astype(jnp.bfloat16), w3_ref[...],
                  preferred_element_type=jnp.float32) + b3_ref[...]
    o_ref[...] = jnp.tanh(out).astype(o_ref.dtype)


def continuous_policy_forward(obs, params, *, batch_tile=256):
    """obs: (B, obs_dim) f32. params: kernel-ready dict (see prepare_params)."""
    w1, b1, w2, b2, w3, b3 = (
        params["W1"], params["b1"], params["W2"],
        params["b2"], params["W3"], params["b3"],
    )
    batch, obs_dim = obs.shape
    act_dim = w3.shape[1]
    args = (obs, w1, b1, w2, b2, w3, b3)

    if batch <= batch_tile:
        # Small batch: single full-array block per operand, no grid, no wrapper
        # pad/slice (full-shape blocks are exempt from the (8,128) rule).
        full = lambda a: pl.BlockSpec(a.shape, lambda: (0,) * a.ndim)
        return pl.pallas_call(
            _policy_kernel,
            out_shape=jax.ShapeDtypeStruct((batch, act_dim), jnp.float32),
            in_specs=[full(a) for a in args],
            out_specs=pl.BlockSpec((batch, act_dim), lambda: (0, 0)),
        )(*args)

    # Large batch: tile the batch axis; weights stay resident across grid steps.
    tm = batch_tile
    pad_b = (-batch) % tm
    if pad_b:
        obs = jnp.pad(obs, ((0, pad_b), (0, 0)))
    b_padded = obs.shape[0]

    resident = lambda a: pl.BlockSpec(a.shape, lambda i: (0,) * a.ndim)
    out = pl.pallas_call(
        _policy_kernel,
        out_shape=jax.ShapeDtypeStruct((b_padded, act_dim), jnp.float32),
        grid=(b_padded // tm,),
        in_specs=[pl.BlockSpec((tm, obs_dim), lambda i: (i, 0)),
                  resident(w1), resident(b1), resident(w2), resident(b2),
                  resident(w3), resident(b3)],
        out_specs=pl.BlockSpec((tm, act_dim), lambda i: (i, 0)),
        compiler_params=pltpu.CompilerParams(
            dimension_semantics=("parallel",)),  # shards batch across v7x's 2 TCs
    )(obs, w1, b1, w2, b2, w3, b3)
    return out[:batch]


def _round_up(x, m):
    return (x + m - 1) // m * m


def init_params(key, obs_dim, act_dim, hidden_layer=(400, 300)):
    """f32 master params mimicking PyTorch nn.Linear default init."""
    dims = [obs_dim, *hidden_layer, act_dim]
    params = {}
    for i in range(len(dims) - 1):
        fan_in, fan_out = dims[i], dims[i + 1]
        key, kw, kb = jax.random.split(key, 3)
        bound = 1.0 / jnp.sqrt(fan_in)
        params[f"W{i + 1}"] = jax.random.uniform(
            kw, (fan_in, fan_out), jnp.float32, -bound, bound)
        params[f"b{i + 1}"] = jax.random.uniform(
            kb, (1, fan_out), jnp.float32, -bound, bound)
    return params


def prepare_params(params):
    """One-time packing of f32 master params for the kernel:
       zero-pad hidden widths to multiples of 128 (exact: padded ReLU units are 0
       and their outgoing weights are 0), cast weight matrices to bf16, keep
       biases in f32."""
    w1, b1 = params["W1"], params["b1"]
    w2, b2 = params["W2"], params["b2"]
    w3, b3 = params["W3"], params["b3"]
    h1, h2 = w1.shape[1], w2.shape[1]
    h1p, h2p = _round_up(h1, 128), _round_up(h2, 128)

    w1 = jnp.pad(w1, ((0, 0), (0, h1p - h1)))
    b1 = jnp.pad(b1, ((0, 0), (0, h1p - h1)))
    w2 = jnp.pad(w2, ((0, h1p - h1), (0, h2p - h2)))
    b2 = jnp.pad(b2, ((0, 0), (0, h2p - h2)))
    w3 = jnp.pad(w3, ((0, h2p - h2), (0, 0)))

    return {"W1": w1.astype(jnp.bfloat16), "b1": b1,
            "W2": w2.astype(jnp.bfloat16), "b2": b2,
            "W3": w3.astype(jnp.bfloat16), "b3": b3}


def reference_forward(obs, master_params):
    """Pure-f32 reference matching the PyTorch module."""
    h1 = jnp.maximum(obs @ master_params["W1"] + master_params["b1"], 0.0)
    h2 = jnp.maximum(h1 @ master_params["W2"] + master_params["b2"], 0.0)
    return jnp.tanh(h2 @ master_params["W3"] + master_params["b3"])


if __name__ == "__main__":
    key = jax.random.PRNGKey(0)
    k_obs, k_params, k_obs2 = jax.random.split(key, 3)

    batch, obs_dim, act_dim = 2, 32, 8
    hidden_layer = (400, 300)

    master = init_params(k_params, obs_dim, act_dim, hidden_layer)
    kernel_params = prepare_params(master)

    # --- Small-batch path (grid-less, full-array blocks, no pad/slice) ---
    obs = jax.random.normal(k_obs, (batch, obs_dim), jnp.float32)
    out = jax.block_until_ready(continuous_policy_forward(obs, kernel_params))
    ref = reference_forward(obs, master)
    assert out.shape == (batch, act_dim)
    assert jnp.allclose(out, ref, atol=2e-2, rtol=2e-2), "mismatch (small batch)"

    # --- Batch-tiled path (weights resident, batch axis 'parallel') ---
    big_batch = 300
    obs2 = jax.random.normal(k_obs2, (big_batch, obs_dim), jnp.float32)
    out2 = jax.block_until_ready(
        continuous_policy_forward(obs2, kernel_params, batch_tile=128))
    ref2 = reference_forward(obs2, master)
    assert out2.shape == (big_batch, act_dim)
    assert jnp.allclose(out2, ref2, atol=2e-2, rtol=2e-2), "mismatch (tiled batch)"

    print("KERNEL_OK")
</pallas_src>

<mosaic_0001>
module attributes {stable_mosaic.version = 11 : i64} {
  func.func @_policy_kernel(%arg0: memref<2x32xf32, #tpu.memory_space<vmem>>, %arg1: memref<32x512xbf16, #tpu.memory_space<vmem>>, %arg2: memref<1x512xf32, #tpu.memory_space<vmem>>, %arg3: memref<512x384xbf16, #tpu.memory_space<vmem>>, %arg4: memref<1x384xf32, #tpu.memory_space<vmem>>, %arg5: memref<384x8xbf16, #tpu.memory_space<vmem>>, %arg6: memref<1x8xf32, #tpu.memory_space<vmem>>, %arg7: memref<2x8xf32, #tpu.memory_space<vmem>>) attributes {dimension_semantics = [], scalar_prefetch = 0 : i64, scratch_operands = 0 : i64, tpu.core_type = #tpu.core_type<tc>} {
    %c0 = arith.constant 0 : index
    %c0_0 = arith.constant 0 : index
    %0 = vector.load %arg0[%c0, %c0_0] : memref<2x32xf32, #tpu.memory_space<vmem>>, vector<2x32xf32>
    %1 = arith.truncf %0 : vector<2x32xf32> to vector<2x32xbf16>
    %c0_1 = arith.constant 0 : index
    %c0_2 = arith.constant 0 : index
    %2 = vector.load %arg1[%c0_1, %c0_2] : memref<32x512xbf16, #tpu.memory_space<vmem>>, vector<32x512xbf16>
    %cst = arith.constant dense<0.000000e+00> : vector<2x512xf32>
    %3 = tpu.matmul %1, %2, %cst {dimension_numbers = #tpu.dot_dimension_numbers<[1], [0], [0], [1], [0, 0, 1, 1], [], []>} : vector<2x32xbf16>, vector<32x512xbf16>, vector<2x512xf32> -> vector<2x512xf32>
    %c0_3 = arith.constant 0 : index
    %c0_4 = arith.constant 0 : index
    %4 = vector.load %arg2[%c0_3, %c0_4] : memref<1x512xf32, #tpu.memory_space<vmem>>, vector<1x512xf32>
    %5 = vector.broadcast %4 : vector<1x512xf32> to vector<2x512xf32>
    %6 = arith.addf %3, %5 : vector<2x512xf32>
    %cst_5 = arith.constant 0.000000e+00 : f32
    %7 = vector.broadcast %cst_5 : f32 to vector<2x512xf32>
    %8 = arith.maximumf %6, %7 : vector<2x512xf32>
    %9 = arith.truncf %8 : vector<2x512xf32> to vector<2x512xbf16>
    %c0_6 = arith.constant 0 : index
    %c0_7 = arith.constant 0 : index
    %10 = vector.load %arg3[%c0_6, %c0_7] : memref<512x384xbf16, #tpu.memory_space<vmem>>, vector<512x384xbf16>
    %cst_8 = arith.constant dense<0.000000e+00> : vector<2x384xf32>
    %11 = tpu.matmul %9, %10, %cst_8 {dimension_numbers = #tpu.dot_dimension_numbers<[1], [0], [0], [1], [0, 0, 1, 1], [], []>} : vector<2x512xbf16>, vector<512x384xbf16>, vector<2x384xf32> -> vector<2x384xf32>
    %c0_9 = arith.constant 0 : index
    %c0_10 = arith.constant 0 : index
    %12 = vector.load %arg4[%c0_9, %c0_10] : memref<1x384xf32, #tpu.memory_space<vmem>>, vector<1x384xf32>
    %13 = vector.broadcast %12 : vector<1x384xf32> to vector<2x384xf32>
    %14 = arith.addf %11, %13 : vector<2x384xf32>
    %cst_11 = arith.constant 0.000000e+00 : f32
    %15 = vector.broadcast %cst_11 : f32 to vector<2x384xf32>
    %16 = arith.maximumf %14, %15 : vector<2x384xf32>
    %17 = arith.truncf %16 : vector<2x384xf32> to vector<2x384xbf16>
    %c0_12 = arith.constant 0 : index
    %c0_13 = arith.constant 0 : index
    %18 = vector.load %arg5[%c0_12, %c0_13] : memref<384x8xbf16, #tpu.memory_space<vmem>>, vector<384x8xbf16>
    %cst_14 = arith.constant dense<0.000000e+00> : vector<2x8xf32>
    %19 = tpu.matmul %17, %18, %cst_14 {dimension_numbers = #tpu.dot_dimension_numbers<[1], [0], [0], [1], [0, 0, 1, 1], [], []>} : vector<2x384xbf16>, vector<384x8xbf16>, vector<2x8xf32> -> vector<2x8xf32>
    %c0_15 = arith.constant 0 : index
    %c0_16 = arith.constant 0 : index
    %20 = vector.load %arg6[%c0_15, %c0_16] : memref<1x8xf32, #tpu.memory_space<vmem>>, vector<1x8xf32>
    %21 = vector.broadcast %20 : vector<1x8xf32> to vector<2x8xf32>
    %22 = arith.addf %19, %21 : vector<2x8xf32>
    %23 = math.tanh %22 : vector<2x8xf32>
    %c0_17 = arith.constant 0 : index
    %c0_18 = arith.constant 0 : index
    %24 = vector.load %arg7[%c0_17, %c0_18] : memref<2x8xf32, #tpu.memory_space<vmem>>, vector<2x8xf32>
    tpu.vector_store %arg7[%c0_17, %c0_18], %23 {strides = array<i32>} : memref<2x8xf32, #tpu.memory_space<vmem>>, vector<2x8xf32>,
    return
  }
}

</mosaic_0001>

<bundles_post_ra>
// kernel: tpu_custom_call.1
= control target key start
LH: loop header
LB: loop body
LE: loop exit
PB: predicated region body
PF: predicated region fallthrough
CT: control target
= control target key end

     0   :  { %12 = vsyncpa [#allocation3], 0  ;;  %s1960_s0 = inlined_call_operand.vmem [shape: f32[2,32], index: 0, kind: input, shape index: {}]   ;;  %s1961_s1 = inlined_call_operand.vmem [shape: bf16[32,512], index: 1, kind: input, shape index: {}]   ;;  %s1962_s2 = inlined_call_operand.vmem [shape: f32[1,512], index: 2, kind: input, shape index: {}]   ;;  %s1963_s3 = inlined_call_operand.hbm [shape: bf16[512,384], index: 3, kind: input, shape index: {}]   ;;  %s1964_s4 = inlined_call_operand.vmem [shape: f32[1,384], index: 4, kind: input, shape index: {}]   ;;  %s1965_s5 = inlined_call_operand.vmem [shape: bf16[384,8], index: 5, kind: input, shape index: {}]   ;;  %s1966_s6 = inlined_call_operand.vmem [shape: f32[1,8], index: 6, kind: input, shape index: {}]   ;;  %s1967_s7 = inlined_call_operand.hbm [shape: f32[2,8], index: 7, kind: output, shape index: {}]  }
   0x1   :  { %13 = vsyncpa [#allocation4], 0  ;;  %s1773_s24 = smov [#allocation2]  }
   0x2   :  { %s25_s25 = sshll.u32 %s1773_s24, 4  ;;  %s26_s25 = int_to_ptr.vmem [resolvable:$true] %s25_s25 }
   0x3   :  { %s1737_s26 = scalar_lea.vmem %s26_s25, 12288  ;;  %p1742_p1 = scmp.lt.s32.totalorder %s26_s25, %s26_s25 }
   0x4   :  { %p1738_p0 = scmp.ne.s32.totalorder %s26_s25, %s1737_s26  ;;  %p1743_p2 = scmp.lt.s32.totalorder %s1737_s26, %s1737_s26 }
   0x6   :  { %p1744_p3 = por %p1743_p2, %p1742_p1 }
   0x8   :  { %p1745_p4 = pnand %p1744_p3, %p1738_p0 }
   0xa   :  { %1748 = shalt.err (!%p1745_p4)
}
   0xb   :  { %s1774_s27 = smov 192   ;;  %s1775_s28 = smov 12  }
   0xc   :  { %31 = dma.hbm_to_vmem [thread:$0]  %s1963_s3, 12288, %s26_s25, [#allocation3], %s1774_s27, %s1774_s27, %s1775_s28  }
   0xd   :  { %1769 = dma.done.wait [#allocation3], 12288  }
   0xe   :  { %1770 = vsyncadd [#allocation3], 4294955008  ;;  %v1776_v0 = vmov 0   ;;  %v1563_v1 = vld [vmem:[%s1961_s1 + $0x24] ss:$16 sps:$4 sm:$0xff]   ;;  %vm114_vm0 = vcmask 261120  }
   0xf   :  { %150 = vmatprep.mubr.bf16.mxu0 %v1776_v0  ;;  %191 = vmatprep.mubr.bf16.mxu1 %v1776_v0  ;;  %v1565_v2 = vld [vmem:[%s1961_s1 + $0x2c] ss:$16 sps:$4 sm:$0xff]   ;;  %v1567_v3 = vld [vmem:[%s1961_s1 + $0x20] ss:$16 sps:$4 sm:$0xff]   ;;  %v1568_v4 = vld [vmem:[%s1961_s1 + $0x28] ss:$16 sps:$4 sm:$0xff]  }
  0x10   :  { %130 = vmatprep.subr.bf16.mxu0 %v1563_v1  ;;  %171 = vmatprep.subr.bf16.mxu1 %v1565_v2  ;;  %v1569_v5 = vld [vmem:[%s1961_s1 + $0x4] ss:$16 sps:$4 sm:$0xff]   ;;  %v1571_v6 = vld [vmem:[%s1961_s1 + $0xc] ss:$16 sps:$4 sm:$0xff]   ;;  %v1573_v7 = vld [vmem:[%s1961_s1] ss:$16 sps:$4 sm:$0xff]  }
  0x11   :  { %131 = vmatpush1.bf16.msra.mxu0 %v1567_v3  ;;  %172 = vmatpush1.bf16.msra.mxu1 %v1568_v4  ;;  %v1574_v8 = vld [vmem:[%s1961_s1 + $0x8] ss:$16 sps:$4 sm:$0xff]   ;;  %v42_v9 = vld [vmem:[%s1960_s0] sm:$0x3]  ;;  %v1581_v17 = vld [vmem:[#allocation2 + $0x90] ss:$12 sps:$4 sm:$0xff]  }
  0x12   :  { %132 = vmatprep.subr.bf16.mxu0 %v1569_v5  ;;  %173 = vmatprep.subr.bf16.mxu1 %v1571_v6  ;;  %v1575_v10 = vld [vmem:[#allocation2 + $0xa8] ss:$12 sps:$4 sm:$0xff]   ;;  %v1577_v11 = vld [vmem:[#allocation2 + $0xac] ss:$12 sps:$4 sm:$0xff]   ;;  %v43_v12 = vpack.c.bf16 %v42_v9, %v42_v9  ;;  %v1584_v18 = vld [vmem:[#allocation2 + $0x210] ss:$12 sps:$4 sm:$0xff]  }
  0x13   :  { %v1578_v13 = vld [vmem:[#allocation2 + $0x228] ss:$12 sps:$4 sm:$0xff]   ;;  %v1580_v14 = vld [vmem:[#allocation2 + $0x22c] ss:$12 sps:$4 sm:$0xff]   ;;  %v1595_v23 = vld [vmem:[#allocation2 + $0x64] ss:$12 sps:$4 sm:$0xff]  }
  0x14   :  { %v1583_v15 = vld [vmem:[#allocation2 + $0x94] ss:$12 sps:$4 sm:$0xff]   ;;  %v1589_v19 = vld [vmem:[#allocation2 + $0x7c] ss:$12 sps:$4 sm:$0xff]   ;;  %v1587_v21 = vld [vmem:[#allocation2 + $0x78] ss:$12 sps:$4 sm:$0xff]  }
  0x15   :  { %133 = vmatpush1.bf16.msra.mxu0 %v1573_v7  ;;  %174 = vmatpush1.bf16.msra.mxu1 %v1574_v8  ;;  %v1586_v16 = vld [vmem:[#allocation2 + $0x214] ss:$12 sps:$4 sm:$0xff]   ;;  %v1592_v20 = vld [vmem:[#allocation2 + $0x1fc] ss:$12 sps:$4 sm:$0xff]   ;;  %v1590_v22 = vld [vmem:[#allocation2 + $0x1f8] ss:$12 sps:$4 sm:$0xff]  }
  0x16   :  { %865 = vmatprep.subr.bf16.mxu0 %v1577_v11  ;;  %906 = vmatprep.subr.bf16.mxu1 %v1580_v14  ;;  %v1598_v24 = vld [vmem:[#allocation2 + $0x1e4] ss:$12 sps:$4 sm:$0xff]   ;;  %v1593_v25 = vld [vmem:[#allocation2 + $0x60] ss:$12 sps:$4 sm:$0xff]   ;;  %v1599_v29 = vld [vmem:[#allocation2 + $0x48] ss:$12 sps:$4 sm:$0xff]  }
  0x17   :  { %v1596_v26 = vld [vmem:[#allocation2 + $0x1e0] ss:$12 sps:$4 sm:$0xff]   ;;  %v1602_v30 = vld [vmem:[#allocation2 + $0x1c8] ss:$12 sps:$4 sm:$0xff]   ;;  %v1605_v33 = vld [vmem:[#allocation2 + $0x30] ss:$12 sps:$4 sm:$0xff]  }
  0x18   :  { %1338 = vmatmul.mubr.msk.bf16.vlgmr.msra.gmra.mxu0 %vm114_vm0, %v43_v12  ;;  %1339 = vmatmul.mubr.msk.bf16.vlgmr.msra.gmra.mxu1 %vm114_vm0, %v43_v12  ;;  %v1601_v27 = vld [vmem:[#allocation2 + $0x4c] ss:$12 sps:$4 sm:$0xff]   ;;  %v1607_v31 = vld [vmem:[#allocation2 + $0x34] ss:$12 sps:$4 sm:$0xff]   ;;  %v1608_v34 = vld [vmem:[#allocation2 + $0x1b0] ss:$12 sps:$4 sm:$0xff]  }
  0x19   :  { %866 = vmatpush1.bf16.msra.mxu0 %v1575_v10  ;;  %907 = vmatpush1.bf16.msra.mxu1 %v1578_v13  ;;  %v1604_v28 = vld [vmem:[#allocation2 + $0x1cc] ss:$12 sps:$4 sm:$0xff]   ;;  %v1610_v32 = vld [vmem:[#allocation2 + $0x1b4] ss:$12 sps:$4 sm:$0xff]   ;;  %v1613_v35 = vld [vmem:[#allocation2 + $0x1c] ss:$12 sps:$4 sm:$0xff]   ;;  %v54_v13 = vlaneseq }
  0x1a   :  { %867 = vmatprep.subr.bf16.mxu0 %v1583_v15  ;;  %908 = vmatprep.subr.bf16.mxu1 %v1586_v16  ;;  %v1616_v36 = vld [vmem:[#allocation2 + $0x19c] ss:$12 sps:$4 sm:$0xff]   ;;  %v1611_v37 = vld [vmem:[#allocation2 + $0x18] ss:$12 sps:$4 sm:$0xff]   ;;  %v1617_v41 = vld [vmem:[#allocation2] ss:$12 sps:$4 sm:$0xff]  }
  0x1b   :  { %v1614_v38 = vld [vmem:[#allocation2 + $0x198] ss:$12 sps:$4 sm:$0xff]   ;;  %v1620_v42 = vld [vmem:[#allocation2 + $0x180] ss:$12 sps:$4 sm:$0xff]   ;;  %v1623_v45 = vld [vmem:[#allocation2 + $0x168] ss:$12 sps:$4 sm:$0xff]  }
  0x1c   :  { %v1619_v39 = vld [vmem:[#allocation2 + $0x4] ss:$12 sps:$4 sm:$0xff]   ;;  %v1625_v43 = vld [vmem:[#allocation2 + $0x16c] ss:$12 sps:$4 sm:$0xff]   ;;  %v1626_v46 = vld [vmem:[#allocation2 + $0x2e8] ss:$12 sps:$4 sm:$0xff]  }
  0x1d   :  { %868 = vmatpush1.bf16.msra.mxu0 %v1581_v17  ;;  %909 = vmatpush1.bf16.msra.mxu1 %v1584_v18  ;;  %v1622_v40 = vld [vmem:[#allocation2 + $0x184] ss:$12 sps:$4 sm:$0xff]   ;;  %v1628_v44 = vld [vmem:[#allocation2 + $0x2ec] ss:$12 sps:$4 sm:$0xff]   ;;  %v1631_v47 = vld [vmem:[#allocation2 + $0x154] ss:$12 sps:$4 sm:$0xff]  }
  0x1e   :  { %869 = vmatprep.subr.bf16.mxu0 %v1589_v19  ;;  %910 = vmatprep.subr.bf16.mxu1 %v1592_v20  ;;  %v1634_v48 = vld [vmem:[#allocation2 + $0x2d4] ss:$12 sps:$4 sm:$0xff]   ;;  %v1629_v49 = vld [vmem:[#allocation2 + $0x150] ss:$12 sps:$4 sm:$0xff]   ;;  %v1635_v53 = vld [vmem:[#allocation2 + $0x138] ss:$12 sps:$4 sm:$0xff]  }
  0x1f   :  { %v1632_v50 = vld [vmem:[#allocation2 + $0x2d0] ss:$12 sps:$4 sm:$0xff]   ;;  %v1638_v54 = vld [vmem:[#allocation2 + $0x2b8] ss:$12 sps:$4 sm:$0xff]   ;;  %v1641_v57 = vld [vmem:[#allocation2 + $0x120] ss:$12 sps:$4 sm:$0xff]  }
  0x20   :  { %v1637_v51 = vld [vmem:[#allocation2 + $0x13c] ss:$12 sps:$4 sm:$0xff]   ;;  %v1643_v55 = vld [vmem:[#allocation2 + $0x124] ss:$12 sps:$4 sm:$0xff]   ;;  %v1644_v58 = vld [vmem:[#allocation2 + $0x2a0] ss:$12 sps:$4 sm:$0xff]  }
  0x21   :  { %870 = vmatpush1.bf16.msra.mxu0 %v1587_v21  ;;  %911 = vmatpush1.bf16.msra.mxu1 %v1590_v22  ;;  %v1640_v52 = vld [vmem:[#allocation2 + $0x2bc] ss:$12 sps:$4 sm:$0xff]   ;;  %v1646_v56 = vld [vmem:[#allocation2 + $0x2a4] ss:$12 sps:$4 sm:$0xff]   ;;  %v1649_v59 = vld [vmem:[#allocation2 + $0x10c] ss:$12 sps:$4 sm:$0xff]  }
  0x22   :  { %871 = vmatprep.subr.bf16.mxu0 %v1595_v23  ;;  %912 = vmatprep.subr.bf16.mxu1 %v1598_v24  ;;  %v1652_v60 = vld [vmem:[#allocation2 + $0x28c] ss:$12 sps:$4 sm:$0xff]   ;;  %v1647_v61 = vld [vmem:[#allocation2 + $0x108] ss:$12 sps:$4 sm:$0xff]   ;;  %v1653_v1 = vld [vmem:[#allocation2 + $0xf0] ss:$12 sps:$4 sm:$0xff]  }
  0x23   :  { %v1650_v62 = vld [vmem:[#allocation2 + $0x288] ss:$12 sps:$4 sm:$0xff]   ;;  %v1656_v2 = vld [vmem:[#allocation2 + $0x270] ss:$12 sps:$4 sm:$0xff]   ;;  %v1659_v5 = vld [vmem:[#allocation2 + $0xd8] ss:$12 sps:$4 sm:$0xff]  }
  0x24   :  { %v1655_v63 = vld [vmem:[#allocation2 + $0xf4] ss:$12 sps:$4 sm:$0xff]   ;;  %v1661_v3 = vld [vmem:[#allocation2 + $0xdc] ss:$12 sps:$4 sm:$0xff]   ;;  %v1662_v6 = vld [vmem:[#allocation2 + $0x258] ss:$12 sps:$4 sm:$0xff]  }
  0x25   :  { %872 = vmatpush1.bf16.msra.mxu0 %v1593_v25  ;;  %913 = vmatpush1.bf16.msra.mxu1 %v1596_v26  ;;  %v1658_v0 = vld [vmem:[#allocation2 + $0x274] ss:$12 sps:$4 sm:$0xff]   ;;  %v1664_v4 = vld [vmem:[#allocation2 + $0x25c] ss:$12 sps:$4 sm:$0xff]   ;;  %v1667_v7 = vld [vmem:[#allocation2 + $0xc4] ss:$12 sps:$4 sm:$0xff]  }
  0x26   :  { %873 = vmatprep.subr.bf16.mxu0 %v1601_v27  ;;  %914 = vmatprep.subr.bf16.mxu1 %v1604_v28  ;;  %v1670_v8 = vld [vmem:[#allocation2 + $0x244] ss:$12 sps:$4 sm:$0xff]   ;;  %v1665_v9 = vld [vmem:[#allocation2 + $0xc0] ss:$12 sps:$4 sm:$0xff]   ;;  %v1850_v14 = vshrl.u32 %v54_v13, 7  ;;  %vm1778_vm1 = vmmov 0  }
  0x27   :  { %v1668_v10 = vld [vmem:[#allocation2 + $0x240] ss:$12 sps:$4 sm:$0xff]   ;;  %v1671_v11 = vld [vmem:[#allocation2 + $0x170] ss:$12 sps:$4 sm:$0xff]   ;;  %s1779_s23 = smov [#allocation5]   ;;  %vm1313_vm2 = vcmask 58368  }
  0x28   :  { %v1672_v12 = vld [vmem:[#allocation2 + $0x2f0] ss:$12 sps:$4 sm:$0xff]   ;;  %v56_v15 = vsub.s32 0, %v1850_v14  ;;  %v64_v16 = vsub.s32 2, %v1850_v14  ;;  %v52_v17 = vld [vmem:[%s1962_s2] sm:$0xf] }
  0x29   :  { %874 = vmatpush1.bf16.msra.mxu0 %v1599_v29  ;;  %915 = vmatpush1.bf16.msra.mxu1 %v1602_v30  ;;  %v60_v18 = vsub.s32 1, %v1850_v14  ;;  %v68_v19 = vsub.s32 3, %v1850_v14  ;;  %v1706_v13 = vld [vmem:[%s1965_s5 + $0x30] sm:$0xff]   ;;  %v1436_v14 = vld [vmem:[%s1966_s6] ss:$0 sm:$0xff]  ;;  %s1321_s24 = sshll.u32 %s1779_s23, 4  ;;  %s1322_s24 = int_to_ptr.vmem [resolvable:$true] %s1321_s24 }
  0x2a   :  { %875 = vmatprep.subr.bf16.mxu0 %v1607_v31  ;;  %916 = vmatprep.subr.bf16.mxu1 %v1610_v32  ;;  %v57_v20 = vrot.slane %v52_v17, %v56_v15  ;;  %v65_v21 = vrot.slane %v52_v17, %v64_v16  ;;  %s1749_s0 = scalar_lea.vmem %s1322_s24, 32  ;;  %p1754_p6 = scmp.lt.s32.totalorder %s1322_s24, %s1322_s24 }
  0x2b   :  { %v61_v22 = vrot.slane %v52_v17, %v60_v18  ;;  %v69_v23 = vrot.slane %v52_v17, %v68_v19  ;;  %v1707_v17 = vld [vmem:[%s1965_s5 + $0x68] sm:$0xff]   ;;  %p1750_p5 = scmp.ne.s32.totalorder %s1322_s24, %s1749_s0  ;;  %p1755_p7 = scmp.lt.s32.totalorder %s1749_s0, %s1749_s0 }
  0x2c   :  { %v1708_v19 = vld [vmem:[%s1965_s5 + $0x28] sm:$0xff]  }
  0x2d   :  { %876 = vmatpush1.bf16.msra.mxu0 %v1605_v33  ;;  %917 = vmatpush1.bf16.msra.mxu1 %v1608_v34  ;;  %p1756_p8 = por %p1755_p7, %p1754_p6 }
  0x2e   :  { %877 = vmatprep.subr.bf16.mxu0 %v1613_v35  ;;  %918 = vmatprep.subr.bf16.mxu1 %v1616_v36 }
  0x2f   :  { %p1757_p9 = pnand %p1756_p8, %p1750_p5 }
  0x31   :  { %878 = vmatpush1.bf16.msra.mxu0 %v1611_v37  ;;  %919 = vmatpush1.bf16.msra.mxu1 %v1614_v38 }
  0x32   :  { %879 = vmatprep.subr.bf16.mxu0 %v1619_v39  ;;  %920 = vmatprep.subr.bf16.mxu1 %v1622_v40 }
  0x35   :  { %880 = vmatpush1.bf16.msra.mxu0 %v1617_v41  ;;  %921 = vmatpush1.bf16.msra.mxu1 %v1620_v42 }
  0x36   :  { %881 = vmatprep.subr.bf16.mxu0 %v1625_v43  ;;  %922 = vmatprep.subr.bf16.mxu1 %v1628_v44  ;;  %v1673_v43 = vld [vmem:[#allocation2 + $0xb0] ss:$12 sps:$4 sm:$0xff]  }
  0x37   :  { %v1674_v44 = vld [vmem:[#allocation2 + $0x230] ss:$12 sps:$4 sm:$0xff]  }
  0x39   :  { %882 = vmatpush2.bf16.msra.mxu0 %v1623_v45  ;;  %923 = vmatpush2.bf16.msra.mxu1 %v1626_v46  ;;  %v1675_v46 = vld [vmem:[#allocation2 + $0x158] ss:$12 sps:$4 sm:$0xff]  }
  0x3a   :  { %883 = vmatprep.subr.bf16.mxu0 %v1631_v47  ;;  %924 = vmatprep.subr.bf16.mxu1 %v1634_v48  ;;  %v1676_v47 = vld [vmem:[#allocation2 + $0x2d8] ss:$12 sps:$4 sm:$0xff]  }
  0x3b   :  { %v1677_v48 = vld [vmem:[#allocation2 + $0x98] ss:$12 sps:$4 sm:$0xff]  }
  0x3d   :  { %884 = vmatpush2.bf16.msra.mxu0 %v1629_v49  ;;  %925 = vmatpush2.bf16.msra.mxu1 %v1632_v50  ;;  %v1678_v49 = vld [vmem:[#allocation2 + $0x218] ss:$12 sps:$4 sm:$0xff]   ;;  %v1679_v50 = vld [vmem:[#allocation2 + $0x140] ss:$12 sps:$4 sm:$0xff]  }
  0x3e   :  { %885 = vmatprep.subr.bf16.mxu0 %v1637_v51  ;;  %926 = vmatprep.subr.bf16.mxu1 %v1640_v52  ;;  %v1680_v51 = vld [vmem:[#allocation2 + $0x2c0] ss:$12 sps:$4 sm:$0xff]  }
  0x3f   :  { %v1681_v52 = vld [vmem:[#allocation2 + $0x80] ss:$12 sps:$4 sm:$0xff]  }
  0x41   :  { %886 = vmatpush2.bf16.msra.mxu0 %v1635_v53  ;;  %927 = vmatpush2.bf16.msra.mxu1 %v1638_v54  ;;  %v1682_v53 = vld [vmem:[#allocation2 + $0x200] ss:$12 sps:$4 sm:$0xff]   ;;  %v1683_v54 = vld [vmem:[#allocation2 + $0x128] ss:$12 sps:$4 sm:$0xff]  }
  0x42   :  { %887 = vmatprep.subr.bf16.mxu0 %v1643_v55  ;;  %928 = vmatprep.subr.bf16.mxu1 %v1646_v56  ;;  %v1684_v55 = vld [vmem:[#allocation2 + $0x2a8] ss:$12 sps:$4 sm:$0xff]  }
  0x43   :  { %v1685_v56 = vld [vmem:[#allocation2 + $0x68] ss:$12 sps:$4 sm:$0xff]  }
  0x45   :  { %888 = vmatpush2.bf16.msra.mxu0 %v1641_v57  ;;  %929 = vmatpush2.bf16.msra.mxu1 %v1644_v58  ;;  %v1686_v57 = vld [vmem:[#allocation2 + $0x1e8] ss:$12 sps:$4 sm:$0xff]   ;;  %v1687_v58 = vld [vmem:[#allocation2 + $0x110] ss:$12 sps:$4 sm:$0xff]  }
  0x46   :  { %889 = vmatprep.subr.bf16.mxu0 %v1649_v59  ;;  %930 = vmatprep.subr.bf16.mxu1 %v1652_v60  ;;  %v1688_v59 = vld [vmem:[#allocation2 + $0x290] ss:$12 sps:$4 sm:$0xff]  }
  0x47   :  { %v1689_v60 = vld [vmem:[#allocation2 + $0x50] ss:$12 sps:$4 sm:$0xff]  }
  0x49   :  { %890 = vmatpush2.bf16.msra.mxu0 %v1647_v61  ;;  %931 = vmatpush2.bf16.msra.mxu1 %v1650_v62  ;;  %v1690_v61 = vld [vmem:[#allocation2 + $0x1d0] ss:$12 sps:$4 sm:$0xff]   ;;  %v1691_v62 = vld [vmem:[#allocation2 + $0xf8] ss:$12 sps:$4 sm:$0xff]  }
  0x4a   :  { %891 = vmatprep.subr.bf16.mxu0 %v1655_v63  ;;  %932 = vmatprep.subr.bf16.mxu1 %v1658_v0  ;;  %v1692_v63 = vld [vmem:[#allocation2 + $0x278] ss:$12 sps:$4 sm:$0xff]  }
  0x4b   :  { %v1693_v0 = vld [vmem:[#allocation2 + $0x38] ss:$12 sps:$4 sm:$0xff]  }
  0x4d   :  { %892 = vmatpush2.bf16.msra.mxu0 %v1653_v1  ;;  %933 = vmatpush2.bf16.msra.mxu1 %v1656_v2  ;;  %v1694_v1 = vld [vmem:[#allocation2 + $0x1b8] ss:$12 sps:$4 sm:$0xff]   ;;  %v1695_v2 = vld [vmem:[#allocation2 + $0xe0] ss:$12 sps:$4 sm:$0xff]  }
  0x4e   :  { %893 = vmatprep.subr.bf16.mxu0 %v1661_v3  ;;  %934 = vmatprep.subr.bf16.mxu1 %v1664_v4  ;;  %v1696_v3 = vld [vmem:[#allocation2 + $0x260] ss:$12 sps:$4 sm:$0xff]  }
  0x4f   :  { %v1697_v4 = vld [vmem:[#allocation2 + $0x20] ss:$12 sps:$4 sm:$0xff]  }
  0x51   :  { %894 = vmatpush2.bf16.msra.mxu0 %v1659_v5  ;;  %935 = vmatpush2.bf16.msra.mxu1 %v1662_v6  ;;  %v1698_v5 = vld [vmem:[#allocation2 + $0x1a0] ss:$12 sps:$4 sm:$0xff]   ;;  %v1699_v6 = vld [vmem:[#allocation2 + $0xc8] ss:$12 sps:$4 sm:$0xff]  }
  0x52   :  { %895 = vmatprep.subr.bf16.mxu0 %v1667_v7  ;;  %936 = vmatprep.subr.bf16.mxu1 %v1670_v8  ;;  %v1700_v7 = vld [vmem:[#allocation2 + $0x248] ss:$12 sps:$4 sm:$0xff]  }
  0x53   :  { %v1701_v8 = vld [vmem:[#allocation2 + $0x8] ss:$12 sps:$4 sm:$0xff]  }
  0x55   :  { %896 = vmatpush2.bf16.msra.mxu0 %v1665_v9  ;;  %937 = vmatpush2.bf16.msra.mxu1 %v1668_v10  ;;  %v1702_v9 = vld [vmem:[#allocation2 + $0x188] ss:$12 sps:$4 sm:$0xff]   ;;  %v1703_v10 = vld [vmem:[%s1965_s5 + $0x78] sm:$0xff]  }
  0x56   :  { %1461 = vmatprep.subr.bf16.mxu0 %v1671_v11  ;;  %1483 = vmatprep.subr.bf16.mxu1 %v1672_v12  ;;  %v1704_v11 = vld [vmem:[%s1965_s5 + $0x38] sm:$0xff]   ;;  %v1705_v12 = vld [vmem:[%s1965_s5 + $0x70] sm:$0xff]  }
  0xd8   :  { %v152_v24 = vpop.f32.mrf.mxu0  ;;  %v193_v25 = vpop.f32.mrf.mxu1 }
  0xd9   :  { %v153_v26 = vadd.f32 %v152_v24, %v57_v20  ;;  %v194_v27 = vadd.f32 %v193_v25, %v65_v21  ;;  %v1709_v20 = vld [vmem:[%s1965_s5 + $0x60] sm:$0xff]   ;;  %v1713_v24 = vld [vmem:[%s1965_s5 + $0x50] sm:$0xff]  }
  0xda   :  { %v154_v28 = vpop.f32.mrf.mxu0  ;;  %v195_v29 = vpop.f32.mrf.mxu1  ;;  %v1710_v21 = vld [vmem:[%s1965_s5 + $0x20] sm:$0xff]   ;;  %v1714_v25 = vld [vmem:[%s1965_s5 + $0x10] sm:$0xff]  }
  0xdb   :  { %v202_v30 = vmax.f32 %v194_v27, 0.0  ;;  %v155_v31 = vadd.f32 %v154_v28, %v61_v22  ;;  %v196_v32 = vadd.f32 %v195_v29, %v69_v23  ;;  %v200_v33 = vmax.f32 %v153_v26, 0.0  ;;  %v1711_v22 = vld [vmem:[%s1965_s5 + $0x58] sm:$0xff]   ;;  %v1715_v26 = vld [vmem:[%s1965_s5 + $0x48] sm:$0xff]   ;;  %v1717_v28 = vld [vmem:[%s1965_s5 + $0x40] sm:$0xff]  }
  0xdc   :  { %v156_v34 = vpop.f32.mrf.mxu0  ;;  %v197_v35 = vpop.f32.mrf.mxu1  ;;  %v1712_v23 = vld [vmem:[%s1965_s5 + $0x18] sm:$0xff]   ;;  %v1716_v27 = vld [vmem:[%s1965_s5 + $0x8] sm:$0xff]   ;;  %v1718_v29 = vld [vmem:[%s1965_s5] sm:$0xff]  }
  0xdd   :  { %v201_v36 = vmax.f32 %v155_v31, 0.0  ;;  %v203_v37 = vmax.f32 %v196_v32, 0.0  ;;  %v1865_v38 = vpack.c.bf16 %v202_v30, %v202_v30  ;;  %v1867_v45 = vpack.c.bf16 %v200_v33, %v200_v33  ;;  %v1719_v30 = vld [vmem:[%s1965_s5 + $0xb8] sm:$0xff]   ;;  %v1720_v32 = vld [vmem:[%s1965_s5 + $0xb0] sm:$0xff]   ;;  %v1721_v33 = vld [vmem:[%s1965_s5 + $0xa8] sm:$0xff]  }
  0xde   :  { %v157_v39 = vpop.f32.mrf.mxu0  ;;  %v198_v40 = vpop.f32.mrf.mxu1  ;;  %v1777_v31 = vmov 0.0   ;;  %v1722_v34 = vld [vmem:[%s1965_s5 + $0xa0] sm:$0xff]   ;;  %v1723_v35 = vld [vmem:[%s1965_s5 + $0x98] sm:$0xff]  }
  0xdf   :  { %v205_v41 = vpack.c.bf16 %v201_v36, %v201_v36  ;;  %v207_v42 = vpack.c.bf16 %v203_v37, %v203_v37  ;;  %v1724_v36 = vld [vmem:[%s1965_s5 + $0x90] sm:$0xff]   ;;  %v1725_v37 = vld [vmem:[%s1965_s5 + $0x88] sm:$0xff]   ;;  %v336_v39 = vld [vmem:[%s1964_s4] sm:$0x7] }
  0xe0   :  { %v341_v40 = vrot.slane %v336_v39, %v56_v15 }
  0xe1   :  { %897 = vmatprep.mubr.bf16.mxu0 %v205_v41  ;;  %938 = vmatprep.mubr.bf16.mxu1 %v207_v42 }
  0xe2   :  { %898 = vmatmul.mubr.bf16.vlgmr.msra.gmra.mxu0 %v1867_v45  ;;  %939 = vmatmul.mubr.bf16.vlgmr.msra.gmra.mxu1 %v1865_v38 }
  0xe3   :  { %1462 = vmatpush3.bf16.msra.mxu0 %v1673_v43  ;;  %1484 = vmatpush3.bf16.msra.mxu1 %v1674_v44 }
  0xe4   :  { %979 = vmatprep.mubr.bf16.mxu0 %v205_v41  ;;  %1019 = vmatprep.mubr.bf16.mxu1 %v207_v42  ;;  %v345_v41 = vrot.slane %v336_v39, %v60_v18 }
  0xe5   :  { %1463 = vmatprep.subr.bf16.mxu0 %v1675_v46  ;;  %1485 = vmatprep.subr.bf16.mxu1 %v1676_v47 }
  0xe7   :  { %1464 = vmatpush3.bf16.msra.mxu0 %v1677_v48  ;;  %1486 = vmatpush3.bf16.msra.mxu1 %v1678_v49 }
  0xe8   :  { %1465 = vmatprep.subr.bf16.mxu0 %v1679_v50  ;;  %1487 = vmatprep.subr.bf16.mxu1 %v1680_v51 }
  0xeb   :  { %1466 = vmatpush3.bf16.msra.mxu0 %v1681_v52  ;;  %1488 = vmatpush3.bf16.msra.mxu1 %v1682_v53 }
  0xec   :  { %1467 = vmatprep.subr.bf16.mxu0 %v1683_v54  ;;  %1489 = vmatprep.subr.bf16.mxu1 %v1684_v55 }
  0xef   :  { %1468 = vmatpush3.bf16.msra.mxu0 %v1685_v56  ;;  %1490 = vmatpush3.bf16.msra.mxu1 %v1686_v57 }
  0xf0   :  { %1469 = vmatprep.subr.bf16.mxu0 %v1687_v58  ;;  %1491 = vmatprep.subr.bf16.mxu1 %v1688_v59  ;;  %v349_v58 = vrot.slane %v336_v39, %v64_v16 }
  0xf3   :  { %1470 = vmatpush3.bf16.msra.mxu0 %v1689_v60  ;;  %1492 = vmatpush3.bf16.msra.mxu1 %v1690_v61 }
  0xf4   :  { %1471 = vmatprep.subr.bf16.mxu0 %v1691_v62  ;;  %1493 = vmatprep.subr.bf16.mxu1 %v1692_v63 }
  0xf7   :  { %1472 = vmatpush3.bf16.msra.mxu0 %v1693_v0  ;;  %1494 = vmatpush3.bf16.msra.mxu1 %v1694_v1 }
  0xf8   :  { %1473 = vmatprep.subr.bf16.mxu0 %v1695_v2  ;;  %1495 = vmatprep.subr.bf16.mxu1 %v1696_v3 }
  0xfb   :  { %1474 = vmatpush3.bf16.msra.mxu0 %v1697_v4  ;;  %1496 = vmatpush3.bf16.msra.mxu1 %v1698_v5 }
  0xfc   :  { %1475 = vmatprep.subr.bf16.mxu0 %v1699_v6  ;;  %1497 = vmatprep.subr.bf16.mxu1 %v1700_v7 }
  0xff   :  { %1476 = vmatpush3.bf16.msra.mxu0 %v1701_v8  ;;  %1498 = vmatpush3.bf16.msra.mxu1 %v1702_v9 }
 0x100   :  { %1505 = vmatprep.subr.bf16.mxu0 %v1703_v10  ;;  %1536 = vmatprep.subr.bf16.mxu1 %v1777_v31 }
 0x102   :  { %980 = vmatmul.mubr.bf16.vlgmr.msra.gmra.mxu0 %v1867_v45  ;;  %1020 = vmatmul.mubr.bf16.vlgmr.msra.gmra.mxu1 %v1865_v38  ;;  %v1726_v38 = vld [vmem:[%s1965_s5 + $0x80] sm:$0xff]  }
 0x103   :  { %1506 = vmatpush3.bf16.msra.mxu0 %v1704_v11  ;;  %1537 = vmatpush3.bf16.msra.mxu1 %v1719_v30 }
 0x104   :  { %1507 = vmatprep.subr.bf16.mxu0 %v1705_v12  ;;  %1538 = vmatprep.subr.bf16.mxu1 %v1777_v31 }
 0x105   :  { %1552 = vmatprep.mubr.msk.bf16.mxu1 %vm1778_vm1, %v1777_v31 }
 0x107   :  { %1508 = vmatpush3.bf16.msra.mxu0 %v1706_v13  ;;  %1539 = vmatpush3.bf16.msra.mxu1 %v1720_v32 }
 0x108   :  { %1509 = vmatprep.subr.bf16.mxu0 %v1707_v17  ;;  %1540 = vmatprep.subr.bf16.mxu1 %v1777_v31 }
 0x10b   :  { %1510 = vmatpush3.bf16.msra.mxu0 %v1708_v19  ;;  %1541 = vmatpush3.bf16.msra.mxu1 %v1721_v33 }
 0x10c   :  { %1511 = vmatprep.subr.bf16.mxu0 %v1709_v20  ;;  %1542 = vmatprep.subr.bf16.mxu1 %v1777_v31 }
 0x10f   :  { %1512 = vmatpush3.bf16.msra.mxu0 %v1710_v21  ;;  %1543 = vmatpush3.bf16.msra.mxu1 %v1722_v34 }
 0x110   :  { %1513 = vmatprep.subr.bf16.mxu0 %v1711_v22  ;;  %1544 = vmatprep.subr.bf16.mxu1 %v1777_v31 }
 0x113   :  { %1514 = vmatpush3.bf16.msra.mxu0 %v1712_v23  ;;  %1545 = vmatpush3.bf16.msra.mxu1 %v1723_v35 }
 0x114   :  { %1515 = vmatprep.subr.bf16.mxu0 %v1713_v24  ;;  %1546 = vmatprep.subr.bf16.mxu1 %v1777_v31 }
 0x117   :  { %1516 = vmatpush3.bf16.msra.mxu0 %v1714_v25  ;;  %1547 = vmatpush3.bf16.msra.mxu1 %v1724_v36 }
 0x118   :  { %1517 = vmatprep.subr.bf16.mxu0 %v1715_v26  ;;  %1548 = vmatprep.subr.bf16.mxu1 %v1777_v31 }
 0x11b   :  { %1518 = vmatpush3.bf16.msra.mxu0 %v1716_v27  ;;  %1549 = vmatpush3.bf16.msra.mxu1 %v1725_v37 }
 0x11c   :  { %1519 = vmatprep.subr.bf16.mxu0 %v1717_v28  ;;  %1550 = vmatprep.subr.bf16.mxu1 %v1777_v31 }
 0x11f   :  { %1520 = vmatpush3.bf16.msra.mxu0 %v1718_v29  ;;  %1551 = vmatpush3.bf16.msra.mxu1 %v1726_v38 }
 0x1a2   :  { %v899_v42 = vpop.f32.mrf.mxu0  ;;  %v940_v43 = vpop.f32.mrf.mxu1 }
 0x1a3   :  { %v900_v44 = vadd.f32 %v899_v42, %v341_v40 }
 0x1a4   :  { %v901_v45 = vpop.f32.mrf.mxu0  ;;  %v942_v46 = vpop.f32.mrf.mxu1 }
 0x1a5   :  { %v941_v47 = vadd.f32 %v940_v43, %v900_v44  ;;  %v902_v48 = vadd.f32 %v901_v45, %v345_v41 }
 0x1a6   :  { %v903_v49 = vpop.f32.mrf.mxu0  ;;  %v944_v50 = vpop.f32.mrf.mxu1 }
 0x1a7   :  { %v943_v51 = vadd.f32 %v942_v46, %v902_v48  ;;  %v1027_v52 = vmax.f32 %v941_v47, 0.0 }
 0x1a8   :  { %v904_v53 = vpop.f32.mrf.mxu0  ;;  %v945_v54 = vpop.f32.mrf.mxu1 }
 0x1a9   :  { %v1028_v55 = vmax.f32 %v943_v51, 0.0  ;;  %v1030_v57 = vpack.c.bf16 %v1027_v52, %v1027_v52 }
 0x1ab   :  { %v1031_v56 = vpack.c.bf16 %v1028_v55, %v1028_v55 }
 0x1ad   :  { %1264 = vmatprep.mubr.bf16.mxu0 %v1031_v56 }
 0x1ae   :  { %1265 = vmatmul.mubr.bf16.vlgmr.msra.gmra.mxu0 %v1030_v57 }
 0x1c2   :  { %v1477_v15 = vpop.f32.mrf.mxu0  ;;  %v1499_v18 = vpop.f32.mrf.mxu1 }
 0x1c4   :  { %v1478_v59 = vpop.f32.mrf.mxu0  ;;  %v1500_v60 = vpop.f32.mrf.mxu1 }
 0x1c5   :  { %v1479_v61 = vadd.f32 %v1478_v59, %v1477_v15  ;;  %v1501_v1 = vadd.f32 %v1500_v60, %v1499_v18 }
 0x1c6   :  { %v1480_v62 = vpop.f32.mrf.mxu0  ;;  %v1502_v63 = vpop.f32.mrf.mxu1 }
 0x1c7   :  { %v982_v0 = vadd.f32 %v1479_v61, %v349_v58 }
 0x1c8   :  { %v1481_v2 = vpop.f32.mrf.mxu0  ;;  %v1503_v3 = vpop.f32.mrf.mxu1 }
 0x1c9   :  { %v1022_v4 = vadd.f32 %v1501_v1, %v982_v0 }
 0x1cb   :  { %v1029_v5 = vmax.f32 %v1022_v4, 0.0 }
 0x1cd   :  { %v1032_v6 = vpack.c.bf16 %v1029_v5, %v1029_v5 }
 0x1cf   :  { %1553 = vmatmul.mubr.bf16.vlgmr.msra.gmra.mxu1 %v1032_v6 }
 0x26e   :  { %v1521_v7 = vpop.f32.mrf.mxu0 }
 0x270   :  { %v1522_v8 = vpop.f32.mrf.mxu0 }
 0x271   :  { %v1523_v11 = vadd.f32 %v1522_v8, %v1521_v7 }
 0x272   :  { %v1524_v9 = vpop.f32.mrf.mxu0 }
 0x273   :  { %v1267_v16 = vadd.f32 %v1523_v11, %v1436_v14 }
 0x274   :  { %v1525_v10 = vpop.f32.mrf.mxu0 }
 0x28f   :  { %v1306_v12 = vpop.f32.mrf.mxu1 }
 0x290   :  { %v1307_v13 = vadd.f32 %v1306_v12, %v1267_v16 }
 0x291   :  { %v1554_v17 = vpop.f32.mrf.mxu1 }
 0x292   :  { %1727 = vtanh.f32 %v1307_v13 }
 0x293   :  { %v1309_v19 = vpop.f32.mrf.mxu1 }
 0x295   :  { %v1555_v20 = vpop.f32.mrf.mxu1 }
 0x29f   :  { %v1728_v21 = vpop.eup %1727 }
 0x2a0   :  { %1314 = vst.msk [vmem:[#allocation5] sm:$0x3] %vm1313_vm2, %v1728_v21 }
 0x2a1   :  { %1760 = shalt.err (!%p1757_p9)
}
 0x2a2   :  { %1324 = dma.vmem_to_hbm [thread:$0]  %s1322_s24, 32, %s1967_s7, [#allocation4]  }
 0x2a3   :  { %1771 = dma.done.wait [#allocation4], 32  }
 0x2a4   :  { %1772 = vsyncadd [#allocation4], 4294967264 }
 0x2a5   :  { %1328 = vsyncpa [#allocation3], 1 }
 0x2a6   :  { %1329 = vsyncpa [#allocation4], 1 }

</bundles_post_ra>
